<compile_context>
chip_gen: v5e
topology: v5e:2x2
jax: 0.10.0
libtpu: 0.0.40
codegen_flags: <defaults>
</compile_context>

<pallas_src>
from functools import partial
from typing import Any, Dict, Optional, Tuple

import jax
import jax.numpy as jnp
from jax import lax
from jax.experimental import pallas as pl
from jax.experimental.pallas import tpu as pltpu

_LANE = 128
_SUBLANE = 8
_MIN_STREAM_PAD = 1024                      # 8 sublanes x 128 lanes
_DEFAULT_SMALL_MAX_ELEMS = 1 << 19          # fused whole-array path budget
_DEFAULT_STREAM_TILE_BYTES = 4 << 20        # ~4 MiB per grid step (8 MiB dbl-buffered)
_VMEM_LIMIT_BYTES = 32 * 1024 * 1024        # safe on v5e/v6e (128 MiB) and v7x (64 MiB)

# state slab columns: 0 = running sum, 1 = running count, 2 = last batch mean
_COL_SUM, _COL_CNT, _COL_MEAN = 0, 1, 2


def _next_pow2(n: int) -> int:
    n = max(int(n), 1)
    return 1 << (n - 1).bit_length()


def _prev_pow2(n: int) -> int:
    n = max(int(n), 1)
    return 1 << (n.bit_length() - 1)


# ----------------------------------------------------------------------------
# Path A: fused whole-array kernel (no grid). Each present loss is its own
# exact-shape VMEM input; everything fits VMEM so there is a single invocation,
# a single DMA pass over the source bytes and a single lane-dense state write.
# ----------------------------------------------------------------------------
def _make_fused_kernel(num_present: int, rows: Tuple[int, ...],
                       sizes: Tuple[int, ...]):
    def kernel(*refs):
        loss_refs = refs[:num_present]
        state_ref = refs[num_present]
        out_ref = refs[num_present + 1]

        # Carry the whole previous state forward (covers pad rows and keys that
        # are not present in this call), then overwrite the touched rows.
        out_ref[...] = state_ref[...]
        lane = lax.broadcasted_iota(jnp.int32, (1, _LANE), 1)
        for j in range(num_present):
            r = rows[j]
            n = float(sizes[j])                       # trace-time constant
            inv = (1.0 / n) if n > 0.0 else 0.0
            # In-register f32 cast (native dtype streamed from HBM).
            s = jnp.sum(loss_refs[j][...].astype(jnp.float32))
            row = state_ref[r:r + 1, :]
            row = row + jnp.where(lane == _COL_SUM, s, 0.0)
            row = row + jnp.where(lane == _COL_CNT, n, 0.0)
            row = jnp.where(lane == _COL_MEAN, s * inv, row)
            out_ref[r:r + 1, :] = row
    return kernel


@partial(jax.jit, static_argnums=(2,), donate_argnums=(1,))
def _fused_step(losses: Tuple[jnp.ndarray, ...], state: jnp.ndarray,
                rows: Tuple[int, ...]):
    num = len(losses)
    k_pad = state.shape[0]

    shaped = []
    for v in losses:
        flat = jnp.ravel(v)                            # native dtype, no copy of note
        n = int(flat.shape[0])
        if n >= _SUBLANE and n % _SUBLANE == 0:
            # Sublane-dense layout (8, n/8): avoids 8x VMEM padding for long rows.
            shaped.append(jnp.reshape(flat, (_SUBLANE, n // _SUBLANE)))
        else:
            shaped.append(jnp.reshape(flat, (1, n)))
    sizes = tuple(int(v.size) for v in losses)

    kernel = _make_fused_kernel(num, rows, sizes)
    in_specs = [pl.BlockSpec(memory_space=pltpu.MemorySpace.VMEM)
                for _ in range(num + 1)]
    return pl.pallas_call(
        kernel,
        out_shape=jax.ShapeDtypeStruct((k_pad, _LANE), jnp.float32),
        in_specs=in_specs,
        out_specs=pl.BlockSpec(memory_space=pltpu.MemorySpace.VMEM),
        input_output_aliases={num: 0},                 # state -> new state in place
        compiler_params=pltpu.CompilerParams(vmem_limit_bytes=_VMEM_LIMIT_BYTES),
    )(*shaped, state)


# ----------------------------------------------------------------------------
# Path B: streaming kernel for very large per-point loss vectors.
# Each key is folded to a dense [8, n_pad/8] layout (n_pad = pow2 bucket), the
# grid tiles the lane axis with ~4 MiB steps, true counts live in SMEM.
# ----------------------------------------------------------------------------
def _make_stream_kernel(num_present: int, rows: Tuple[int, ...]):
    def kernel(*refs):
        loss_refs = refs[:num_present]
        counts_ref = refs[num_present]          # SMEM f32 [num_present]
        state_ref = refs[num_present + 1]       # VMEM [K_pad, 128], resident
        out_ref = refs[num_present + 2]         # VMEM [K_pad, 128], resident
        acc_ref = refs[num_present + 3]         # VMEM scratch [K_pad, 128]
        t = pl.program_id(0)

        @pl.when(t == 0)
        def _():
            acc_ref[...] = jnp.zeros_like(acc_ref)

        # Per-step partial sums (cast to f32 in-register; padding rows are 0).
        # The per-step cross-lane reduce is fully hidden under the >=1 MiB DMA.
        for j in range(num_present):
            acc_ref[j:j + 1, :] += jnp.sum(loss_refs[j][...].astype(jnp.float32))

        @pl.when(t == pl.num_programs(0) - 1)
        def _():
            out_ref[...] = state_ref[...]        # carry pad rows / absent keys
            lane = lax.broadcasted_iota(jnp.int32, (1, _LANE), 1)
            for j in range(num_present):
                r = rows[j]
                tot = acc_ref[j:j + 1, :]        # every lane == batch sum
                n_s = counts_ref[j]              # runtime count (SMEM scalar)
                inv = 1.0 / jnp.maximum(n_s, 1.0)   # n==0 -> sum==0 -> mean 0
                row = state_ref[r:r + 1, :]
                row = row + jnp.where(lane == _COL_SUM, tot, 0.0)
                row = row + jnp.where(lane == _COL_CNT, n_s, 0.0)
                row = jnp.where(lane == _COL_MEAN, tot * inv, row)
                out_ref[r:r + 1, :] = row
    return kernel


@partial(jax.jit, static_argnums=(1,))
def _pad_fold(v: jnp.ndarray, n_pad: int) -> jnp.ndarray:
    """Ravel + zero-pad to n_pad (pow2 bucket) + fold to a dense [8, n_pad/8]."""
    flat = jnp.ravel(v)
    pad = n_pad - int(flat.shape[0])
    if pad:
        flat = jnp.pad(flat, (0, pad))
    return jnp.reshape(flat, (_SUBLANE, n_pad // _SUBLANE))


@partial(jax.jit, static_argnums=(3, 4), donate_argnums=(2,))
def _stream_step(folded: Tuple[jnp.ndarray, ...], counts: jnp.ndarray,
                 state: jnp.ndarray, rows: Tuple[int, ...], tile_bytes: int):
    num = len(folded)
    k_pad = state.shape[0]
    n_lanes = int(folded[0].shape[1])                  # pow2, >= 128

    # Tile the lane axis so each grid step streams ~tile_bytes across all keys.
    per_lane_bytes = sum(_SUBLANE * f.dtype.itemsize for f in folded)
    tl = _prev_pow2(max(1, int(tile_bytes) // max(per_lane_bytes, 1)))
    tl = max(_LANE, min(tl, n_lanes))                  # pow2 -> divides n_lanes
    n_tiles = n_lanes // tl

    kernel = _make_stream_kernel(num, rows)
    in_specs = [pl.BlockSpec((_SUBLANE, tl), lambda t: (0, t)) for _ in folded]
    in_specs.append(pl.BlockSpec(memory_space=pltpu.MemorySpace.SMEM))   # counts
    in_specs.append(pl.BlockSpec((k_pad, _LANE), lambda t: (0, 0)))      # state

    return pl.pallas_call(
        kernel,
        out_shape=jax.ShapeDtypeStruct((k_pad, _LANE), jnp.float32),
        grid_spec=pltpu.PrefetchScalarGridSpec(
            num_scalar_prefetch=0,
            grid=(n_tiles,),
            in_specs=in_specs,
            out_specs=pl.BlockSpec((k_pad, _LANE), lambda t: (0, 0)),
            scratch_shapes=[pltpu.VMEM((k_pad, _LANE), jnp.float32)],
        ),
        input_output_aliases={num + 1: 0},             # state -> new state in place
        compiler_params=pltpu.CompilerParams(
            dimension_semantics=("arbitrary",),
            vmem_limit_bytes=_VMEM_LIMIT_BYTES),
    )(*folded, counts, state)


# ----------------------------------------------------------------------------
# Python-side tracker mirroring BaseTracker's structure.
# ----------------------------------------------------------------------------
class BaseTrackerJax:
    """JAX/Pallas port of BaseTracker: packed persistent running state on device,
    one Pallas kernel call per track_loss step."""

    def __init__(self, stage: str = "train",
                 small_path_max_elems: int = _DEFAULT_SMALL_MAX_ELEMS,
                 stream_tile_bytes: int = _DEFAULT_STREAM_TILE_BYTES):
        self.stage = stage
        self._finalised = False
        self._keys = []                                 # stage-prefixed keys
        self._key_index: Dict[str, int] = {}
        self._state: Optional[jnp.ndarray] = None       # [K_pad, 128] f32
        self._small_path_max_elems = int(small_path_max_elems)
        self._stream_tile_bytes = int(stream_tile_bytes)

    # TODO(synk): track() is abstract in BaseTracker (raises NotImplementedError).
    def track(self, output_model, *args, **kwargs) -> Dict[str, Any]:
        return {}

    @property
    def loss_metrics(self) -> Dict[str, Any]:
        if self._state is None:
            return {}
        return {k: (self._state[i, _COL_SUM], self._state[i, _COL_CNT])
                for k, i in self._key_index.items()}

    def _ensure_state(self):
        k_pad = max(_SUBLANE,
                    ((len(self._keys) + _SUBLANE - 1) // _SUBLANE) * _SUBLANE)
        if self._state is None:
            self._state = jnp.zeros((k_pad, _LANE), jnp.float32)
        elif self._state.shape[0] < k_pad:
            self._state = jnp.pad(
                self._state, ((0, k_pad - self._state.shape[0]), (0, 0)))

    def track_loss(self, losses: Dict[str, Any]) -> Dict[str, jnp.ndarray]:
        if not losses:
            return {}

        present_rows, present_vals, zero_size = [], [], set()
        for key, val in losses.items():
            lk = f"{self.stage}_{key}"
            if lk not in self._key_index:
                self._key_index[lk] = len(self._keys)
                self._keys.append(lk)
            arr = jnp.asarray(val)
            if arr.size == 0:
                # TODO(synk): torch AverageMeter on an empty tensor yields NaN;
                # we skip it (contributes nothing) and report 0.0 for this batch.
                zero_size.add(lk)
                continue
            present_rows.append(self._key_index[lk])
            present_vals.append(arr)

        self._ensure_state()

        if present_vals:
            total_elems = sum(int(v.size) for v in present_vals)
            if total_elems <= self._small_path_max_elems:
                # Fused path: exact shapes, native dtype, no padding/stacking.
                new_state = _fused_step(tuple(present_vals), self._state,
                                        tuple(present_rows))
            else:
                # Streaming path: pow2-bucketed fold + runtime counts (no
                # recompile on ragged counts; compiles bounded by log2 buckets).
                max_elems = max(int(v.size) for v in present_vals)
                n_pad = max(_MIN_STREAM_PAD, _next_pow2(max_elems))
                folded = tuple(_pad_fold(v, n_pad) for v in present_vals)
                counts = jnp.asarray([float(v.size) for v in present_vals],
                                     jnp.float32)
                new_state = _stream_step(folded, counts, self._state,
                                         tuple(present_rows),
                                         self._stream_tile_bytes)
            self._state = new_state

        out_loss: Dict[str, jnp.ndarray] = {}
        for key in losses.keys():
            lk = f"{self.stage}_{key}"
            if lk in zero_size:
                out_loss[lk] = jnp.zeros((), jnp.float32)
            else:
                out_loss[lk] = self._state[self._key_index[lk], _COL_MEAN]
        return out_loss

    def forward(self, output_model: Dict[str, Any],
                losses: Optional[Dict[str, Any]] = None,
                *args, **kwargs) -> Dict[str, Any]:
        if self._finalised:
            raise RuntimeError(
                "Cannot track new values with a finalised tracker, "
                "you need to reset it first")
        tracked_metric = self.track(output_model, *args, **kwargs)
        if losses is not None:
            tracked_loss = self.track_loss(losses)
            tracked_results = dict(**tracked_loss, **tracked_metric)
        else:
            tracked_results = tracked_metric
        return tracked_results

    __call__ = forward

    # TODO(synk): _finalise() is abstract in BaseTracker (metric aggregation).
    def _finalise(self) -> Dict[str, Any]:
        return {}

    def get_final_loss_metrics(self) -> Dict[str, jnp.ndarray]:
        metrics: Dict[str, jnp.ndarray] = {}
        if self._state is not None and self._keys:
            # NOTE: f32 running sum/count can lose precision over extremely long
            # epochs (counts > 2^24); acceptable for loss logging.
            sums = self._state[:, _COL_SUM]
            cnts = jnp.maximum(self._state[:, _COL_CNT], 1.0)
            means = sums / cnts
            for lk, i in self._key_index.items():
                metrics[lk] = means[i]
        self._state = None
        self._keys = []
        self._key_index = {}
        return metrics

    def finalise(self) -> Dict[str, Any]:
        metrics = self._finalise()
        self._finalised = True
        loss_metrics = self.get_final_loss_metrics()
        return {**loss_metrics, **metrics}


# ----------------------------------------------------------------------------
# Demo / correctness check (small deterministic shapes).
# ----------------------------------------------------------------------------
if __name__ == "__main__":
    ks = jax.random.split(jax.random.PRNGKey(0), 9)

    # Path A (fused whole-array): mixed scalar / ragged vector losses.
    a1 = jax.random.uniform(ks[0], ())
    v1 = jax.random.uniform(ks[1], (128,))
    r1 = jax.random.uniform(ks[2], (100,))
    a2 = jax.random.uniform(ks[3], ())
    v2 = jax.random.uniform(ks[4], (128,))
    x2 = jax.random.uniform(ks[5], (64,))

    tr = BaseTrackerJax(stage="train")
    out1 = tr({"preds": None}, losses={"loss": a1, "loss_seg": v1, "loss_reg": r1})
    out2 = tr({"preds": None}, losses={"loss": a2, "loss_seg": v2, "loss_aux": x2})
    fin = tr.finalise()

    # Path B (streaming, multi-tile grid): force it with a tiny tile budget so
    # the test stays small while exercising the pipelined reduction.
    u1 = jax.random.uniform(ks[6], (4000,))
    w1 = jax.random.uniform(ks[7], (100,))
    u2 = jax.random.uniform(ks[8], (3000,))
    tr2 = BaseTrackerJax(stage="val", small_path_max_elems=0, stream_tile_bytes=4096)
    s_out1 = tr2({"preds": None}, losses={"loss": u1, "loss_reg": w1})
    s_out2 = tr2({"preds": None}, losses={"loss": u2})
    s_fin = tr2.finalise()

    jax.block_until_ready(jax.tree_util.tree_leaves(
        (out1, out2, fin, s_out1, s_out2, s_fin)))

    def close(a, b):
        return bool(jnp.allclose(jnp.asarray(a, jnp.float32),
                                 jnp.asarray(b, jnp.float32),
                                 rtol=1e-4, atol=1e-4))

    ok = True
    # batch means returned by forward()
    ok &= close(out1["train_loss"], a1)
    ok &= close(out1["train_loss_seg"], jnp.mean(v1))
    ok &= close(out1["train_loss_reg"], jnp.mean(r1))
    ok &= close(out2["train_loss"], a2)
    ok &= close(out2["train_loss_seg"], jnp.mean(v2))
    ok &= close(out2["train_loss_aux"], jnp.mean(x2))
    # finalise() -> element-weighted running means
    ok &= close(fin["train_loss"], (a1 + a2) / 2.0)
    ok &= close(fin["train_loss_seg"], (jnp.sum(v1) + jnp.sum(v2)) / 256.0)
    ok &= close(fin["train_loss_reg"], jnp.mean(r1))
    ok &= close(fin["train_loss_aux"], jnp.mean(x2))
    # streaming path
    ok &= close(s_out1["val_loss"], jnp.mean(u1))
    ok &= close(s_out1["val_loss_reg"], jnp.mean(w1))
    ok &= close(s_out2["val_loss"], jnp.mean(u2))
    ok &= close(s_fin["val_loss"], (jnp.sum(u1) + jnp.sum(u2)) / 7000.0)
    ok &= close(s_fin["val_loss_reg"], jnp.mean(w1))

    print("KERNEL_OK" if ok else "MISMATCH")
</pallas_src>

<mosaic_0001>
module attributes {stable_mosaic.version = 11 : i64} {
  func.func @kernel(%arg0: memref<1x1xf32, #tpu.memory_space<vmem>>, %arg1: memref<8x16xf32, #tpu.memory_space<vmem>>, %arg2: memref<1x100xf32, #tpu.memory_space<vmem>>, %arg3: memref<8x128xf32, #tpu.memory_space<vmem>>, %arg4: memref<8x128xf32, #tpu.memory_space<vmem>>) attributes {dimension_semantics = [], scalar_prefetch = 0 : i64, scratch_operands = 0 : i64, tpu.core_type = #tpu.core_type<tc>} {
    %c0 = arith.constant 0 : index
    %c0_0 = arith.constant 0 : index
    %0 = vector.load %arg3[%c0, %c0_0] : memref<8x128xf32, #tpu.memory_space<vmem>>, vector<8x128xf32>
    %c0_1 = arith.constant 0 : index
    %c0_2 = arith.constant 0 : index
    %1 = vector.load %arg4[%c0_1, %c0_2] : memref<8x128xf32, #tpu.memory_space<vmem>>, vector<8x128xf32>
    tpu.vector_store %arg4[%c0_1, %c0_2], %0 {strides = array<i32>} : memref<8x128xf32, #tpu.memory_space<vmem>>, vector<8x128xf32>,
    %2 = tpu.iota {dimensions = array<i32: 1>} : vector<1x128xi32>
    %c0_3 = arith.constant 0 : index
    %c0_4 = arith.constant 0 : index
    %3 = vector.load %arg0[%c0_3, %c0_4] : memref<1x1xf32, #tpu.memory_space<vmem>>, vector<1x1xf32>
    %4 = vector.shape_cast %3 : vector<1x1xf32> to vector<1x1x1xf32>
    %cst = arith.constant dense<0.000000e+00> : vector<1xf32>
    %5 = vector.multi_reduction <add>, %4, %cst [1, 2] : vector<1x1x1xf32> to vector<1xf32>
    %6 = vector.shape_cast %5 : vector<1xf32> to vector<1x1x1xf32>
    %7 = vector.extract %6[0, 0, 0] : f32 from vector<1x1x1xf32>
    %c0_5 = arith.constant 0 : index
    %c0_6 = arith.constant 0 : index
    %8 = vector.load %arg3[%c0_5, %c0_6] : memref<8x128xf32, #tpu.memory_space<vmem>>, vector<1x128xf32>
    %c0_i32 = arith.constant 0 : i32
    %9 = vector.broadcast %c0_i32 : i32 to vector<1x128xi32>
    %10 = arith.cmpi eq, %2, %9 : vector<1x128xi32>
    %cst_7 = arith.constant 0.000000e+00 : f32
    %11 = vector.broadcast %7 : f32 to vector<1x128xf32>
    %12 = vector.broadcast %cst_7 : f32 to vector<1x128xf32>
    %13 = arith.select %10, %11, %12 : vector<1x128xi1>, vector<1x128xf32>
    %14 = arith.addf %8, %13 : vector<1x128xf32>
    %c1_i32 = arith.constant 1 : i32
    %15 = vector.broadcast %c1_i32 : i32 to vector<1x128xi32>
    %16 = arith.cmpi eq, %2, %15 : vector<1x128xi32>
    %cst_8 = arith.constant 1.000000e+00 : f32
    %cst_9 = arith.constant 0.000000e+00 : f32
    %17 = vector.broadcast %cst_8 : f32 to vector<1x128xf32>
    %18 = vector.broadcast %cst_9 : f32 to vector<1x128xf32>
    %19 = arith.select %16, %17, %18 : vector<1x128xi1>, vector<1x128xf32>
    %20 = arith.addf %14, %19 : vector<1x128xf32>
    %c2_i32 = arith.constant 2 : i32
    %21 = vector.broadcast %c2_i32 : i32 to vector<1x128xi32>
    %22 = arith.cmpi eq, %2, %21 : vector<1x128xi32>
    %cst_10 = arith.constant 1.000000e+00 : f32
    %23 = arith.mulf %7, %cst_10 : f32
    %24 = vector.broadcast %23 : f32 to vector<1x128xf32>
    %25 = arith.select %22, %24, %20 : vector<1x128xi1>, vector<1x128xf32>
    %c0_11 = arith.constant 0 : index
    %c0_12 = arith.constant 0 : index
    %26 = vector.load %arg4[%c0_11, %c0_12] : memref<8x128xf32, #tpu.memory_space<vmem>>, vector<1x128xf32>
    tpu.vector_store %arg4[%c0_11, %c0_12], %25 {strides = array<i32>} : memref<8x128xf32, #tpu.memory_space<vmem>>, vector<1x128xf32>,
    %c0_13 = arith.constant 0 : index
    %c0_14 = arith.constant 0 : index
    %27 = vector.load %arg1[%c0_13, %c0_14] : memref<8x16xf32, #tpu.memory_space<vmem>>, vector<8x16xf32>
    %28 = vector.shape_cast %27 : vector<8x16xf32> to vector<1x8x16xf32>
    %cst_15 = arith.constant dense<0.000000e+00> : vector<1xf32>
    %29 = vector.multi_reduction <add>, %28, %cst_15 [1, 2] : vector<1x8x16xf32> to vector<1xf32>
    %30 = vector.shape_cast %29 : vector<1xf32> to vector<1x1x1xf32>
    %31 = vector.extract %30[0, 0, 0] : f32 from vector<1x1x1xf32>
    %c1 = arith.constant 1 : index
    %c0_16 = arith.constant 0 : index
    %32 = vector.load %arg3[%c1, %c0_16] : memref<8x128xf32, #tpu.memory_space<vmem>>, vector<1x128xf32>
    %c0_i32_17 = arith.constant 0 : i32
    %33 = vector.broadcast %c0_i32_17 : i32 to vector<1x128xi32>
    %34 = arith.cmpi eq, %2, %33 : vector<1x128xi32>
    %cst_18 = arith.constant 0.000000e+00 : f32
    %35 = vector.broadcast %31 : f32 to vector<1x128xf32>
    %36 = vector.broadcast %cst_18 : f32 to vector<1x128xf32>
    %37 = arith.select %34, %35, %36 : vector<1x128xi1>, vector<1x128xf32>
    %38 = arith.addf %32, %37 : vector<1x128xf32>
    %c1_i32_19 = arith.constant 1 : i32
    %39 = vector.broadcast %c1_i32_19 : i32 to vector<1x128xi32>
    %40 = arith.cmpi eq, %2, %39 : vector<1x128xi32>
    %cst_20 = arith.constant 1.280000e+02 : f32
    %cst_21 = arith.constant 0.000000e+00 : f32
    %41 = vector.broadcast %cst_20 : f32 to vector<1x128xf32>
    %42 = vector.broadcast %cst_21 : f32 to vector<1x128xf32>
    %43 = arith.select %40, %41, %42 : vector<1x128xi1>, vector<1x128xf32>
    %44 = arith.addf %38, %43 : vector<1x128xf32>
    %c2_i32_22 = arith.constant 2 : i32
    %45 = vector.broadcast %c2_i32_22 : i32 to vector<1x128xi32>
    %46 = arith.cmpi eq, %2, %45 : vector<1x128xi32>
    %cst_23 = arith.constant 7.812500e-03 : f32
    %47 = arith.mulf %31, %cst_23 : f32
    %48 = vector.broadcast %47 : f32 to vector<1x128xf32>
    %49 = arith.select %46, %48, %44 : vector<1x128xi1>, vector<1x128xf32>
    %c1_24 = arith.constant 1 : index
    %c0_25 = arith.constant 0 : index
    %50 = vector.load %arg4[%c1_24, %c0_25] : memref<8x128xf32, #tpu.memory_space<vmem>>, vector<1x128xf32>
    tpu.vector_store %arg4[%c1_24, %c0_25], %49 {strides = array<i32>} : memref<8x128xf32, #tpu.memory_space<vmem>>, vector<1x128xf32>,
    %c0_26 = arith.constant 0 : index
    %c0_27 = arith.constant 0 : index
    %51 = vector.load %arg2[%c0_26, %c0_27] : memref<1x100xf32, #tpu.memory_space<vmem>>, vector<1x100xf32>
    %52 = vector.shape_cast %51 : vector<1x100xf32> to vector<1x1x100xf32>
    %cst_28 = arith.constant dense<0.000000e+00> : vector<1xf32>
    %53 = vector.multi_reduction <add>, %52, %cst_28 [1, 2] : vector<1x1x100xf32> to vector<1xf32>
    %54 = vector.shape_cast %53 : vector<1xf32> to vector<1x1x1xf32>
    %55 = vector.extract %54[0, 0, 0] : f32 from vector<1x1x1xf32>
    %c2 = arith.constant 2 : index
    %c0_29 = arith.constant 0 : index
    %56 = vector.load %arg3[%c2, %c0_29] : memref<8x128xf32, #tpu.memory_space<vmem>>, vector<1x128xf32>
    %c0_i32_30 = arith.constant 0 : i32
    %57 = vector.broadcast %c0_i32_30 : i32 to vector<1x128xi32>
    %58 = arith.cmpi eq, %2, %57 : vector<1x128xi32>
    %cst_31 = arith.constant 0.000000e+00 : f32
    %59 = vector.broadcast %55 : f32 to vector<1x128xf32>
    %60 = vector.broadcast %cst_31 : f32 to vector<1x128xf32>
    %61 = arith.select %58, %59, %60 : vector<1x128xi1>, vector<1x128xf32>
    %62 = arith.addf %56, %61 : vector<1x128xf32>
    %c1_i32_32 = arith.constant 1 : i32
    %63 = vector.broadcast %c1_i32_32 : i32 to vector<1x128xi32>
    %64 = arith.cmpi eq, %2, %63 : vector<1x128xi32>
    %cst_33 = arith.constant 1.000000e+02 : f32
    %cst_34 = arith.constant 0.000000e+00 : f32
    %65 = vector.broadcast %cst_33 : f32 to vector<1x128xf32>
    %66 = vector.broadcast %cst_34 : f32 to vector<1x128xf32>
    %67 = arith.select %64, %65, %66 : vector<1x128xi1>, vector<1x128xf32>
    %68 = arith.addf %62, %67 : vector<1x128xf32>
    %c2_i32_35 = arith.constant 2 : i32
    %69 = vector.broadcast %c2_i32_35 : i32 to vector<1x128xi32>
    %70 = arith.cmpi eq, %2, %69 : vector<1x128xi32>
    %cst_36 = arith.constant 0.00999999977 : f32
    %71 = arith.mulf %55, %cst_36 : f32
    %72 = vector.broadcast %71 : f32 to vector<1x128xf32>
    %73 = arith.select %70, %72, %68 : vector<1x128xi1>, vector<1x128xf32>
    %c2_37 = arith.constant 2 : index
    %c0_38 = arith.constant 0 : index
    %74 = vector.load %arg4[%c2_37, %c0_38] : memref<8x128xf32, #tpu.memory_space<vmem>>, vector<1x128xf32>
    tpu.vector_store %arg4[%c2_37, %c0_38], %73 {strides = array<i32>} : memref<8x128xf32, #tpu.memory_space<vmem>>, vector<1x128xf32>,
    return
  }
}

</mosaic_0001>

<bundles_post_ra>
// kernel: _fused_step.1
= control target key start
LH: loop header
LB: loop body
LE: loop exit
PB: predicated region body
PF: predicated region fallthrough
CT: control target
= control target key end

     0   :  { %s226_s0 = inlined_call_operand.<no memory space> [shape: f32[1,1], index: 0, kind: input, shape index: {}]   ;;  %s227_s1 = inlined_call_operand.vmem [shape: f32[8,16], index: 1, kind: input, shape index: {}]   ;;  %s228_s2 = inlined_call_operand.vmem [shape: f32[1,100], index: 2, kind: input, shape index: {}]   ;;  %s229_s3 = inlined_call_operand.hbm [shape: f32[8,128], index: 3, kind: input, shape index: {}, may-alias: {3,4}]   ;;  %s230_s4 = inlined_call_operand.hbm [shape: f32[8,128], index: 4, kind: output, shape index: {}, may-alias: {3,4}]  }
   0x1   :  { %v9_v0 = vstv %s226_s0 }
   0x2   :  { %10 = vst [vmem:[#allocation2] sm:$0x1] %v9_v0 }
   0x3   :  { %11 = vsyncpa [#allocation4], 0 }
   0x4   :  { %12 = vsyncpa [#allocation5], 0  ;;  %s24_s19 = sshll.u32 %s229_s3, 4  ;;  %s174_s20 = smov [#allocation3]   ;;  %s25_s19 = int_to_ptr.hbm [resolvable:$true] %s24_s19 }
   0x5   :  { %s26_s21 = sshll.u32 %s174_s20, 4  ;;  %s27_s21 = int_to_ptr.vmem [resolvable:$true] %s26_s21 }
   0x6   :  { %29 = dma.hbm_to_vmem [thread:$0]  %s25_s19, 128, %s27_s21, [#allocation4]  }
   0x7   :  { %170 = dma.done.wait [#allocation4], 128  }
   0x8   :  { %171 = vsyncadd [#allocation4], 4294967168  ;;  %vm53_vm0 = vcmask 130048   ;;  %v52_v1 = vld [vmem:[%s227_s1] sm:$0xff]  ;;  %vm75_vm1 = vcmask 811008   ;;  %v36_v21 = vlaneseq  ;;  %v175_v26 = vmov 0.0  }
   0x9   :  { %v54_v2 = vsel %vm53_vm0, %v52_v1, 0.0  ;;  %v74_v3 = vld [vmem:[%s228_s2] sm:$0x1]  ;;  %v34_v6 = vld [vmem:[#allocation3] sm:$0xff]  ;;  %s176_s27 = smov [#allocation6]   ;;  %s103_s5 = sshll.u32 %s230_s4, 4  ;;  %s104_s5 = int_to_ptr.hbm [resolvable:$true] %s103_s5 }
   0xa   :  { %55 = vadd.xlane.f32.xlu0 %v54_v2  ;;  %v76_v4 = vsel %vm75_vm1, %v74_v3, 0.0  ;;  %v38_v5 = vld [vmem:[#allocation2] sm:$0x1]  ;;  %35 = vst [vmem:[#allocation6] sm:$0xff] %v34_v6  ;;  %v37_v22 = vand.u32 127, %v36_v21  ;;  %s101_s28 = sshll.u32 %s176_s27, 4  ;;  %s102_s28 = int_to_ptr.vmem [resolvable:$true] %s101_s28 }
   0xb   :  { %113 = vpush %v38_v5  ;;  %v41_v23 = vld [vmem:[#allocation3] sm:$0x1]  ;;  %v64_v31 = vld [vmem:[#allocation3 + $0x1] sm:$0x1]  ;;  %v86_v39 = vld [vmem:[#allocation3 + $0x2] sm:$0x1] }
   0xc   :  { %vm42_vm2 = vcmp.eq.s32.totalorder %v37_v22, 0  ;;  %vm46_vm3 = vcmp.eq.s32.totalorder %v37_v22, 1  ;;  %vm49_vm4 = vcmp.eq.s32.totalorder %v37_v22, 2 }
   0xd   :  { %v47_v27 = vsel %vm46_vm3, 1.0, %v175_v26  ;;  %v68_v34 = vsel %vm46_vm3, 128.0, %v175_v26  ;;  %v90_v42 = vsel %vm46_vm3, 100.0, %v175_v26 }
  0x12   :  { %77 = vadd.xlane.f32.xlu0 %v76_v4 }
  0x3c   :  { %s114_s1 = spop %113 }
  0x3d   :  { %v43_v24 = vstv %s114_s1 }
  0x3e   :  { %v44_v25 = vsel %vm42_vm2, %v43_v24, 0.0 }
  0x3f   :  { %v45_v28 = vadd.f32 %v44_v25, %v41_v23 }
  0x41   :  { %v48_v29 = vadd.f32 %v47_v27, %v45_v28 }
  0x43   :  { %v50_v30 = vsel %vm49_vm4, %v43_v24, %v48_v29 }
  0x44   :  { %51 = vst [vmem:[#allocation6] sm:$0x1] %v50_v30 }
  0x7d   :  { %v56_v7 = vpop.xlane.xlu0 %55 }
  0x7e   :  { %v57_v8 = vrot.slane %v56_v7, 4 }
  0x80   :  { %v58_v9 = vadd.f32 %v57_v8, %v56_v7 }
  0x82   :  { %v59_v10 = vrot.slane %v58_v9, 2 }
  0x84   :  { %v60_v11 = vadd.f32 %v59_v10, %v58_v9 }
  0x85   :  { %v78_v12 = vpop.xlane.xlu0 %77 }
  0x86   :  { %v79_v13 = vrot.slane %v78_v12, 4  ;;  %v61_v14 = vrot.slane %v60_v11, 1 }
  0x88   :  { %v80_v15 = vadd.f32 %v79_v13, %v78_v12  ;;  %v62_v16 = vadd.f32 %v61_v14, %v60_v11 }
  0x8a   :  { %v81_v17 = vrot.slane %v80_v15, 2  ;;  %115 = vpush %v62_v16 }
  0x8c   :  { %v82_v18 = vadd.f32 %v81_v17, %v80_v15 }
  0x8e   :  { %v83_v19 = vrot.slane %v82_v18, 1 }
  0x90   :  { %v84_v20 = vadd.f32 %v83_v19, %v82_v18 }
  0x92   :  { %117 = vpush %v84_v20 }
  0xbb   :  { %s116_s2 = spop %115 }
  0xbc   :  { %v65_v32 = vstv %s116_s2  ;;  %s70_s3 = smul.f32 0.0078125, %s116_s2 }
  0xbd   :  { %v66_v33 = vsel %vm42_vm2, %v65_v32, 0.0 }
  0xbe   :  { %v67_v35 = vadd.f32 %v66_v33, %v64_v31  ;;  %v71_v37 = vstv %s70_s3 }
  0xc0   :  { %v69_v36 = vadd.f32 %v68_v34, %v67_v35 }
  0xc2   :  { %v72_v38 = vsel %vm49_vm4, %v71_v37, %v69_v36 }
  0xc3   :  { %73 = vst [vmem:[#allocation6 + $0x1] sm:$0x1] %v72_v38  ;;  %s118_s25 = spop %117 }
  0xc4   :  { %v87_v40 = vstv %s118_s25  ;;  %s92_s26 = smul.f32 0.01, %s118_s25 }
  0xc5   :  { %v88_v41 = vsel %vm42_vm2, %v87_v40, 0.0 }
  0xc6   :  { %v89_v43 = vadd.f32 %v88_v41, %v86_v39  ;;  %v93_v45 = vstv %s92_s26 }
  0xc8   :  { %v91_v44 = vadd.f32 %v90_v42, %v89_v43 }
  0xca   :  { %v94_v46 = vsel %vm49_vm4, %v93_v45, %v91_v44 }
  0xcb   :  { %95 = vst [vmem:[#allocation6 + $0x2] sm:$0x1] %v94_v46 }
  0xcc   :  { %106 = dma.vmem_to_hbm [thread:$0]  %s102_s28, 128, %s104_s5, [#allocation5]  }
  0xcd   :  { %172 = dma.done.wait [#allocation5], 128  }
  0xce   :  { %173 = vsyncadd [#allocation5], 4294967168 }
  0xcf   :  { %111 = vsyncpa [#allocation4], 1 }
  0xd0   :  { %112 = vsyncpa [#allocation5], 1 }

</bundles_post_ra>
